<compile_context>
chip_gen: v6e
topology: v6e:2x2x1
jax: 0.10.0
libtpu: 0.0.40
codegen_flags: <defaults>
</compile_context>

<pallas_src>
import functools

import jax
import jax.numpy as jnp
from jax.experimental import pallas as pl
from jax.experimental.pallas import tpu as pltpu

EPS = 1e-5
VMEM_LIMIT = 32 * 1024 * 1024  # explicit scoped-VMEM budget, safe on v5e/v6e/v7x


# ----------------------------------------------------------------------------
# Pass 1: depthwise 3x3 conv (lane-folded) + BN1 per-lane partial sum / sumsq
# ----------------------------------------------------------------------------
def dw_conv_stats_kernel(x_ref, wdw_ref, y_ref, s_ref, sq_ref, xp_ref, *, stride, cin):
    # x_ref  : (1, H, W*Cin)        one lane-folded image (wrapper-side reshape)
    # wdw_ref: (9, Wout*Cin)        lane-tiled depthwise taps (row k = (kh, kw))
    # y_ref  : (1, Hout, Wout*Cin)  raw depthwise output (folded)
    # s_ref  : (1, 1, Wout*Cin)     per-image per-lane sums
    # sq_ref : (1, 1, Wout*Cin)     per-image per-lane sums of squares
    # xp_ref : VMEM scratch (H+2, (W+2)*Cin)  zero-padded image (folded)
    H = x_ref.shape[1]
    WC_img = x_ref.shape[2]
    W = WC_img // cin
    Hout, WC = y_ref.shape[1], y_ref.shape[2]
    Wout = WC // cin
    WCp = xp_ref.shape[1]
    f32 = jnp.float32

    # Zero only the halo border (not the whole padded buffer); the interior is
    # fully overwritten below.  Re-zeroed every step so the kernel stays
    # correct even if the "parallel" batch axis is sharded across TensorCores
    # (each core has its own scratch).
    xp_ref[0:1, :] = jnp.zeros((1, WCp), f32)
    xp_ref[H + 1:H + 2, :] = jnp.zeros((1, WCp), f32)
    xp_ref[1:H + 1, 0:cin] = jnp.zeros((H, cin), f32)
    xp_ref[1:H + 1, (W + 1) * cin:(W + 2) * cin] = jnp.zeros((H, cin), f32)
    # TODO(synk): this interior store is lane-offset by Cin (masked vst); a
    # lane-0-aligned layout with border selects on the kw=0/2 taps would avoid it.
    xp_ref[1:H + 1, cin:(W + 1) * cin] = x_ref[0].astype(f32)

    wdw = wdw_ref[...].astype(f32)   # hoisted: load all 9 taps once
    xp = xp_ref[...]                 # hoisted: single load of the padded image

    if stride == 1:
        # Lane-folded taps: contiguous 2D slices, one FMA per tap.
        acc = jnp.zeros((Hout, WC), f32)
        for kh in range(3):
            for kw in range(3):
                k = kh * 3 + kw
                tap = xp[kh:kh + Hout, kw * cin:kw * cin + WC]
                acc = acc + tap * wdw[k:k + 1, :]
    else:
        # TODO(synk): for stride > 1 move the row/col decimation into the DMA
        # (strided index_map) instead of strided in-VMEM slices.
        xp3 = xp.reshape(H + 2, W + 2, cin)
        acc3 = jnp.zeros((Hout, Wout, cin), f32)
        for kh in range(3):
            for kw in range(3):
                k = kh * 3 + kw
                w_k = wdw[k:k + 1, 0:cin]   # (1, cin): first replica of the tap
                tap = xp3[kh:kh + (Hout - 1) * stride + 1:stride,
                          kw:kw + (Wout - 1) * stride + 1:stride, :]
                acc3 = acc3 + tap * w_k
        acc = acc3.reshape(Hout, WC)

    y_ref[0] = acc
    s_ref[0] = jnp.sum(acc, axis=0, keepdims=True)
    sq_ref[0] = jnp.sum(acc * acc, axis=0, keepdims=True)


# ----------------------------------------------------------------------------
# Pass 2: fused BN1 scale/shift + ReLU + 1x1 conv (one MXU matmul) + BN2 stats
# ----------------------------------------------------------------------------
def bn1_pw_stats_kernel(y_ref, s1_ref, b1_ref, wbig_ref, z_ref, s_ref, sq_ref):
    # y_ref   : (1, Hout, Wout*Cin)       raw depthwise output (folded)
    # s1_ref  : (1, Wout*Cin)             BN1 scale, lane-tiled
    # b1_ref  : (1, Wout*Cin)             BN1 shift, lane-tiled
    # wbig_ref: (Wout*Cin, Wout*Cout)     block-diagonal 1x1-conv weight
    # z_ref   : (1, Hout, Wout*Cout)      raw pointwise output (lane-dense)
    # s_ref   : (1, 1, Wout*Cout)         per-image per-lane sums
    # sq_ref  : (1, 1, Wout*Cout)         per-image per-lane sums of squares
    y = jnp.maximum(y_ref[0].astype(jnp.float32) * s1_ref[...] + b1_ref[...], 0.0)

    # 1x1 conv as a single MXU matmul against the block-diagonal weight built
    # in the wrapper; the result is already lane-dense (Wout*Cout lanes), so
    # there is no per-channel FMA loop and no lane repack.
    z = jnp.dot(y, wbig_ref[...].astype(jnp.float32),
                preferred_element_type=jnp.float32)

    z_ref[0] = z
    s_ref[0] = jnp.sum(z, axis=0, keepdims=True)
    sq_ref[0] = jnp.sum(z * z, axis=0, keepdims=True)


# ----------------------------------------------------------------------------
# Wrapper
# ----------------------------------------------------------------------------
def basic_block(x_nhwc, w_dw, gamma1, beta1, w_pw, gamma2, beta2, *, stride=1):
    """x_nhwc: (N, H, W, Cin). Returns (N, Hout, Wout, Cout)."""
    N, H, W, Cin = x_nhwc.shape
    Cout = w_pw.shape[1]
    Hout = (H + 2 - 3) // stride + 1
    Wout = (W + 2 - 3) // stride + 1
    WC_in = Wout * Cin
    WC_out = Wout * Cout
    f32 = jnp.float32
    count = float(N * Hout * Wout)

    # Free metadata reshape: lane-folded input, no in-kernel relayout needed.
    x_fold = x_nhwc.reshape(N, H, W * Cin).astype(f32)

    # Tiny parameter-side glue (built once, fused by XLA):
    wdw_tiled = jnp.tile(w_dw.reshape(9, Cin).astype(f32), (1, Wout))   # (9, Wout*Cin)
    # Block-diagonal 1x1-conv weight so the pointwise conv is one MXU matmul
    # in the lane-folded layout:  z = y @ w_big.
    w_big = jnp.kron(jnp.eye(Wout, dtype=f32), w_pw.astype(f32))        # (WC_in, WC_out)

    cp = pltpu.CompilerParams(dimension_semantics=("parallel",),
                              vmem_limit_bytes=VMEM_LIMIT)
    # TODO(synk): on v7x, use pltpu.CORE_PARALLEL / core_map (or an extra
    # parallel row-block axis) to guarantee the batch axis shards across both
    # TensorCores; plain "parallel" is kept here for portability.

    # ---- pass 1: depthwise conv + BN1 per-lane partial stats ----
    y1, s1p, q1p = pl.pallas_call(
        functools.partial(dw_conv_stats_kernel, stride=stride, cin=Cin),
        grid=(N,),
        in_specs=[
            pl.BlockSpec((1, H, W * Cin), lambda n: (n, 0, 0)),
            pl.BlockSpec((9, WC_in), lambda n: (0, 0)),
        ],
        out_specs=(
            pl.BlockSpec((1, Hout, WC_in), lambda n: (n, 0, 0)),
            pl.BlockSpec((1, 1, WC_in), lambda n: (n, 0, 0)),
            pl.BlockSpec((1, 1, WC_in), lambda n: (n, 0, 0)),
        ),
        out_shape=(
            jax.ShapeDtypeStruct((N, Hout, WC_in), f32),
            jax.ShapeDtypeStruct((N, 1, WC_in), f32),
            jax.ShapeDtypeStruct((N, 1, WC_in), f32),
        ),
        scratch_shapes=[pltpu.VMEM((H + 2, (W + 2) * Cin), f32)],
        compiler_params=cp,
    )(x_fold, wdw_tiled)

    # ---- finalize BN1: fuse into one scale/shift (tiny per-channel math) ----
    # TODO(synk): E[x^2]-E[x]^2 is cancellation-prone at scale; use centered /
    # Welford sums if this block is used beyond toy sizes.
    sum1 = jnp.sum(s1p.reshape(N, Wout, Cin), axis=(0, 1))
    sq1 = jnp.sum(q1p.reshape(N, Wout, Cin), axis=(0, 1))
    mean1 = sum1 / count
    var1 = jnp.maximum(sq1 / count - mean1 * mean1, 0.0)
    scale1 = gamma1 * jax.lax.rsqrt(var1 + EPS)
    shift1 = beta1 - mean1 * scale1
    scale1_f = jnp.tile(scale1.reshape(1, Cin), (1, Wout))          # (1, Wout*Cin)
    shift1_f = jnp.tile(shift1.reshape(1, Cin), (1, Wout))

    # ---- pass 2: BN1 + ReLU + 1x1 conv (MXU) + BN2 per-lane partial stats ----
    z, s2p, q2p = pl.pallas_call(
        bn1_pw_stats_kernel,
        grid=(N,),
        in_specs=[
            pl.BlockSpec((1, Hout, WC_in), lambda n: (n, 0, 0)),
            pl.BlockSpec((1, WC_in), lambda n: (0, 0)),
            pl.BlockSpec((1, WC_in), lambda n: (0, 0)),
            pl.BlockSpec((WC_in, WC_out), lambda n: (0, 0)),
        ],
        out_specs=(
            pl.BlockSpec((1, Hout, WC_out), lambda n: (n, 0, 0)),
            pl.BlockSpec((1, 1, WC_out), lambda n: (n, 0, 0)),
            pl.BlockSpec((1, 1, WC_out), lambda n: (n, 0, 0)),
        ),
        out_shape=(
            jax.ShapeDtypeStruct((N, Hout, WC_out), f32),
            jax.ShapeDtypeStruct((N, 1, WC_out), f32),
            jax.ShapeDtypeStruct((N, 1, WC_out), f32),
        ),
        compiler_params=cp,
    )(y1, scale1_f, shift1_f, w_big)

    # ---- finalize BN2 + ReLU + un-fold in plain jnp (XLA fuses with reshape;
    #      a dedicated elementwise pallas_call costs more than it computes) ----
    sum2 = jnp.sum(s2p.reshape(N, Wout, Cout), axis=(0, 1))
    sq2 = jnp.sum(q2p.reshape(N, Wout, Cout), axis=(0, 1))
    mean2 = sum2 / count
    var2 = jnp.maximum(sq2 / count - mean2 * mean2, 0.0)
    scale2 = gamma2 * jax.lax.rsqrt(var2 + EPS)
    shift2 = beta2 - mean2 * scale2
    z4 = z.reshape(N, Hout, Wout, Cout)
    return jnp.maximum(z4 * scale2 + shift2, 0.0)


# ----------------------------------------------------------------------------
# Pure-JAX reference (lax convs) mirroring the PyTorch forward in NHWC.
# ----------------------------------------------------------------------------
def _reference(x_nhwc, w_dw, gamma1, beta1, w_pw, gamma2, beta2, stride=1):
    Cin = x_nhwc.shape[-1]
    k_dw = w_dw.reshape(3, 3, 1, Cin)
    y = jax.lax.conv_general_dilated(
        x_nhwc, k_dw, window_strides=(stride, stride), padding=((1, 1), (1, 1)),
        dimension_numbers=("NHWC", "HWIO", "NHWC"), feature_group_count=Cin)
    m = jnp.mean(y, axis=(0, 1, 2))
    v = jnp.mean((y - m) ** 2, axis=(0, 1, 2))
    y = jnp.maximum((y - m) * jax.lax.rsqrt(v + EPS) * gamma1 + beta1, 0.0)
    k_pw = w_pw.reshape(1, 1, *w_pw.shape)
    z = jax.lax.conv_general_dilated(
        y, k_pw, window_strides=(1, 1), padding="VALID",
        dimension_numbers=("NHWC", "HWIO", "NHWC"))
    m2 = jnp.mean(z, axis=(0, 1, 2))
    v2 = jnp.mean((z - m2) ** 2, axis=(0, 1, 2))
    return jnp.maximum((z - m2) * jax.lax.rsqrt(v2 + EPS) * gamma2 + beta2, 0.0)


if __name__ == "__main__":
    # Small shapes implied by the module: BasicBlock(inplanes=4, planes=8)
    N, H, W = 2, 16, 16
    inplanes, planes, stride = 4, 8, 1

    key = jax.random.PRNGKey(0)
    k1, k2, k3 = jax.random.split(key, 3)

    # Input generated directly in NHWC (PyTorch equivalent: NCHW (2, 4, 16, 16)).
    x = jax.random.normal(k1, (N, H, W, inplanes), jnp.float32)
    # conv1 weight: PyTorch depthwise (Cin,1,3,3) -> stored as (3,3,Cin)
    w_dw = jax.random.normal(k2, (3, 3, inplanes), jnp.float32) * 0.1
    # conv2 weight: PyTorch (Cout,Cin,1,1) -> stored as (Cin,Cout)
    w_pw = jax.random.normal(k3, (inplanes, planes), jnp.float32) * 0.1

    gamma1 = jnp.linspace(0.9, 1.1, inplanes, dtype=jnp.float32)
    beta1 = jnp.linspace(-0.1, 0.1, inplanes, dtype=jnp.float32)
    gamma2 = jnp.linspace(0.8, 1.2, planes, dtype=jnp.float32)
    beta2 = jnp.linspace(-0.2, 0.2, planes, dtype=jnp.float32)

    fn = jax.jit(functools.partial(basic_block, stride=stride))
    out = jax.block_until_ready(fn(x, w_dw, gamma1, beta1, w_pw, gamma2, beta2))

    ref = _reference(x, w_dw, gamma1, beta1, w_pw, gamma2, beta2, stride=stride)
    assert out.shape == (N, H, W, planes)
    assert jnp.allclose(out, ref, atol=1e-4, rtol=1e-4), float(jnp.max(jnp.abs(out - ref)))

    print("KERNEL_OK")
</pallas_src>

<mosaic_0001>
module attributes {stable_mosaic.version = 11 : i64} {
  func.func @dw_conv_stats_kernel(%arg0: i32, %arg1: memref<1x16x64xf32, #tpu.memory_space<vmem>>, %arg2: memref<9x64xf32, #tpu.memory_space<vmem>>, %arg3: memref<1x16x64xf32, #tpu.memory_space<vmem>>, %arg4: memref<1x1x64xf32, #tpu.memory_space<vmem>>, %arg5: memref<1x1x64xf32, #tpu.memory_space<vmem>>, %arg6: memref<18x72xf32, #tpu.memory_space<vmem>>) attributes {dimension_semantics = [#tpu.dimension_semantics<parallel>], iteration_bounds = array<i64: 2>, scalar_prefetch = 0 : i64, scratch_operands = 1 : i64, tpu.core_type = #tpu.core_type<tc>, window_params = [{transform_indices = @transform_0, window_bounds = array<i64: 1, 16, 64>}, {pipeline_mode = #tpu.pipeline_mode<synchronous>, transform_indices = @transform_1, window_bounds = array<i64: 9, 64>}, {transform_indices = @transform_2, window_bounds = array<i64: 1, 16, 64>}, {transform_indices = @transform_3, window_bounds = array<i64: 1, 1, 64>}, {transform_indices = @transform_4, window_bounds = array<i64: 1, 1, 64>}]} {
    %cst = arith.constant 0.000000e+00 : f32
    %0 = vector.broadcast %cst : f32 to vector<1x72xf32>
    %c0 = arith.constant 0 : index
    %c0_0 = arith.constant 0 : index
    %1 = vector.load %arg6[%c0, %c0_0] : memref<18x72xf32, #tpu.memory_space<vmem>>, vector<1x72xf32>
    tpu.vector_store %arg6[%c0, %c0_0], %0 {strides = array<i32>} : memref<18x72xf32, #tpu.memory_space<vmem>>, vector<1x72xf32>,
    %cst_1 = arith.constant 0.000000e+00 : f32
    %2 = vector.broadcast %cst_1 : f32 to vector<1x72xf32>
    %c17 = arith.constant 17 : index
    %c0_2 = arith.constant 0 : index
    %3 = vector.load %arg6[%c17, %c0_2] : memref<18x72xf32, #tpu.memory_space<vmem>>, vector<1x72xf32>
    tpu.vector_store %arg6[%c17, %c0_2], %2 {strides = array<i32>} : memref<18x72xf32, #tpu.memory_space<vmem>>, vector<1x72xf32>,
    %cst_3 = arith.constant 0.000000e+00 : f32
    %4 = vector.broadcast %cst_3 : f32 to vector<16x4xf32>
    %c1 = arith.constant 1 : index
    %c0_4 = arith.constant 0 : index
    %5 = vector.load %arg6[%c1, %c0_4] : memref<18x72xf32, #tpu.memory_space<vmem>>, vector<16x4xf32>
    tpu.vector_store %arg6[%c1, %c0_4], %4 {strides = array<i32>} : memref<18x72xf32, #tpu.memory_space<vmem>>, vector<16x4xf32>,
    %cst_5 = arith.constant 0.000000e+00 : f32
    %6 = vector.broadcast %cst_5 : f32 to vector<16x4xf32>
    %c1_6 = arith.constant 1 : index
    %c68 = arith.constant 68 : index
    %7 = vector.load %arg6[%c1_6, %c68] : memref<18x72xf32, #tpu.memory_space<vmem>>, vector<16x4xf32>
    tpu.vector_store %arg6[%c1_6, %c68], %6 {strides = array<i32>} : memref<18x72xf32, #tpu.memory_space<vmem>>, vector<16x4xf32>,
    %c0_7 = arith.constant 0 : index
    %c0_8 = arith.constant 0 : index
    %c0_9 = arith.constant 0 : index
    %8 = vector.load %arg1[%c0_7, %c0_8, %c0_9] : memref<1x16x64xf32, #tpu.memory_space<vmem>>, vector<1x16x64xf32>
    %9 = vector.shape_cast %8 : vector<1x16x64xf32> to vector<16x64xf32>
    %c1_10 = arith.constant 1 : index
    %c4 = arith.constant 4 : index
    %10 = vector.load %arg6[%c1_10, %c4] : memref<18x72xf32, #tpu.memory_space<vmem>>, vector<16x64xf32>
    tpu.vector_store %arg6[%c1_10, %c4], %9 {strides = array<i32>} : memref<18x72xf32, #tpu.memory_space<vmem>>, vector<16x64xf32>,
    %c0_11 = arith.constant 0 : index
    %c0_12 = arith.constant 0 : index
    %11 = vector.load %arg2[%c0_11, %c0_12] : memref<9x64xf32, #tpu.memory_space<vmem>>, vector<9x64xf32>
    %c0_13 = arith.constant 0 : index
    %c0_14 = arith.constant 0 : index
    %12 = vector.load %arg6[%c0_13, %c0_14] : memref<18x72xf32, #tpu.memory_space<vmem>>, vector<18x72xf32>
    %cst_15 = arith.constant 0.000000e+00 : f32
    %13 = vector.broadcast %cst_15 : f32 to vector<16x64xf32>
    %14 = vector.extract_strided_slice %12 {offsets = [0, 0], sizes = [16, 64], strides = [1, 1]} : vector<18x72xf32> to vector<16x64xf32>
    %15 = vector.extract_strided_slice %11 {offsets = [0, 0], sizes = [1, 64], strides = [1, 1]} : vector<9x64xf32> to vector<1x64xf32>
    %16 = vector.broadcast %15 : vector<1x64xf32> to vector<16x64xf32>
    %17 = arith.mulf %14, %16 : vector<16x64xf32>
    %18 = arith.addf %13, %17 : vector<16x64xf32>
    %19 = vector.extract_strided_slice %12 {offsets = [0, 4], sizes = [16, 64], strides = [1, 1]} : vector<18x72xf32> to vector<16x64xf32>
    %20 = vector.extract_strided_slice %11 {offsets = [1, 0], sizes = [1, 64], strides = [1, 1]} : vector<9x64xf32> to vector<1x64xf32>
    %21 = vector.broadcast %20 : vector<1x64xf32> to vector<16x64xf32>
    %22 = arith.mulf %19, %21 : vector<16x64xf32>
    %23 = arith.addf %18, %22 : vector<16x64xf32>
    %24 = vector.extract_strided_slice %12 {offsets = [0, 8], sizes = [16, 64], strides = [1, 1]} : vector<18x72xf32> to vector<16x64xf32>
    %25 = vector.extract_strided_slice %11 {offsets = [2, 0], sizes = [1, 64], strides = [1, 1]} : vector<9x64xf32> to vector<1x64xf32>
    %26 = vector.broadcast %25 : vector<1x64xf32> to vector<16x64xf32>
    %27 = arith.mulf %24, %26 : vector<16x64xf32>
    %28 = arith.addf %23, %27 : vector<16x64xf32>
    %29 = vector.extract_strided_slice %12 {offsets = [1, 0], sizes = [16, 64], strides = [1, 1]} : vector<18x72xf32> to vector<16x64xf32>
    %30 = vector.extract_strided_slice %11 {offsets = [3, 0], sizes = [1, 64], strides = [1, 1]} : vector<9x64xf32> to vector<1x64xf32>
    %31 = vector.broadcast %30 : vector<1x64xf32> to vector<16x64xf32>
    %32 = arith.mulf %29, %31 : vector<16x64xf32>
    %33 = arith.addf %28, %32 : vector<16x64xf32>
    %34 = vector.extract_strided_slice %12 {offsets = [1, 4], sizes = [16, 64], strides = [1, 1]} : vector<18x72xf32> to vector<16x64xf32>
    %35 = vector.extract_strided_slice %11 {offsets = [4, 0], sizes = [1, 64], strides = [1, 1]} : vector<9x64xf32> to vector<1x64xf32>
    %36 = vector.broadcast %35 : vector<1x64xf32> to vector<16x64xf32>
    %37 = arith.mulf %34, %36 : vector<16x64xf32>
    %38 = arith.addf %33, %37 : vector<16x64xf32>
    %39 = vector.extract_strided_slice %12 {offsets = [1, 8], sizes = [16, 64], strides = [1, 1]} : vector<18x72xf32> to vector<16x64xf32>
    %40 = vector.extract_strided_slice %11 {offsets = [5, 0], sizes = [1, 64], strides = [1, 1]} : vector<9x64xf32> to vector<1x64xf32>
    %41 = vector.broadcast %40 : vector<1x64xf32> to vector<16x64xf32>
    %42 = arith.mulf %39, %41 : vector<16x64xf32>
    %43 = arith.addf %38, %42 : vector<16x64xf32>
    %44 = vector.extract_strided_slice %12 {offsets = [2, 0], sizes = [16, 64], strides = [1, 1]} : vector<18x72xf32> to vector<16x64xf32>
    %45 = vector.extract_strided_slice %11 {offsets = [6, 0], sizes = [1, 64], strides = [1, 1]} : vector<9x64xf32> to vector<1x64xf32>
    %46 = vector.broadcast %45 : vector<1x64xf32> to vector<16x64xf32>
    %47 = arith.mulf %44, %46 : vector<16x64xf32>
    %48 = arith.addf %43, %47 : vector<16x64xf32>
    %49 = vector.extract_strided_slice %12 {offsets = [2, 4], sizes = [16, 64], strides = [1, 1]} : vector<18x72xf32> to vector<16x64xf32>
    %50 = vector.extract_strided_slice %11 {offsets = [7, 0], sizes = [1, 64], strides = [1, 1]} : vector<9x64xf32> to vector<1x64xf32>
    %51 = vector.broadcast %50 : vector<1x64xf32> to vector<16x64xf32>
    %52 = arith.mulf %49, %51 : vector<16x64xf32>
    %53 = arith.addf %48, %52 : vector<16x64xf32>
    %54 = vector.extract_strided_slice %12 {offsets = [2, 8], sizes = [16, 64], strides = [1, 1]} : vector<18x72xf32> to vector<16x64xf32>
    %55 = vector.extract_strided_slice %11 {offsets = [8, 0], sizes = [1, 64], strides = [1, 1]} : vector<9x64xf32> to vector<1x64xf32>
    %56 = vector.broadcast %55 : vector<1x64xf32> to vector<16x64xf32>
    %57 = arith.mulf %54, %56 : vector<16x64xf32>
    %58 = arith.addf %53, %57 : vector<16x64xf32>
    %c0_16 = arith.constant 0 : index
    %c0_17 = arith.constant 0 : index
    %c0_18 = arith.constant 0 : index
    %59 = vector.load %arg3[%c0_16, %c0_17, %c0_18] : memref<1x16x64xf32, #tpu.memory_space<vmem>>, vector<1x16x64xf32>
    %60 = vector.shape_cast %59 : vector<1x16x64xf32> to vector<16x64xf32>
    %61 = vector.shape_cast %58 : vector<16x64xf32> to vector<1x16x64xf32>
    tpu.vector_store %arg3[%c0_16, %c0_17, %c0_18], %61 {strides = array<i32>} : memref<1x16x64xf32, #tpu.memory_space<vmem>>, vector<1x16x64xf32>,
    %cst_19 = arith.constant dense<0.000000e+00> : vector<64xf32>
    %62 = vector.multi_reduction <add>, %58, %cst_19 [0] : vector<16x64xf32> to vector<64xf32>
    %63 = vector.shape_cast %62 : vector<64xf32> to vector<1x64xf32>
    %c0_20 = arith.constant 0 : index
    %c0_21 = arith.constant 0 : index
    %c0_22 = arith.constant 0 : index
    %64 = vector.load %arg4[%c0_20, %c0_21, %c0_22] : memref<1x1x64xf32, #tpu.memory_space<vmem>>, vector<1x1x64xf32>
    %65 = vector.shape_cast %64 : vector<1x1x64xf32> to vector<1x64xf32>
    %66 = vector.shape_cast %63 : vector<1x64xf32> to vector<1x1x64xf32>
    tpu.vector_store %arg4[%c0_20, %c0_21, %c0_22], %66 {strides = array<i32>} : memref<1x1x64xf32, #tpu.memory_space<vmem>>, vector<1x1x64xf32>,
    %67 = arith.mulf %58, %58 : vector<16x64xf32>
    %cst_23 = arith.constant dense<0.000000e+00> : vector<64xf32>
    %68 = vector.multi_reduction <add>, %67, %cst_23 [0] : vector<16x64xf32> to vector<64xf32>
    %69 = vector.shape_cast %68 : vector<64xf32> to vector<1x64xf32>
    %c0_24 = arith.constant 0 : index
    %c0_25 = arith.constant 0 : index
    %c0_26 = arith.constant 0 : index
    %70 = vector.load %arg5[%c0_24, %c0_25, %c0_26] : memref<1x1x64xf32, #tpu.memory_space<vmem>>, vector<1x1x64xf32>
    %71 = vector.shape_cast %70 : vector<1x1x64xf32> to vector<1x64xf32>
    %72 = vector.shape_cast %69 : vector<1x64xf32> to vector<1x1x64xf32>
    tpu.vector_store %arg5[%c0_24, %c0_25, %c0_26], %72 {strides = array<i32>} : memref<1x1x64xf32, #tpu.memory_space<vmem>>, vector<1x1x64xf32>,
    return
  }
  func.func @transform_0(%arg0: i32) -> (i32, i32, i32) {
    %c0_i32 = arith.constant 0 : i32
    %c0_i32_0 = arith.constant 0 : i32
    %c0_i32_1 = arith.constant 0 : i32
    return %arg0, %c0_i32, %c0_i32_0 : i32, i32, i32
  }
  func.func @transform_1(%arg0: i32) -> (i32, i32) {
    %c0_i32 = arith.constant 0 : i32
    %c0_i32_0 = arith.constant 0 : i32
    %c0_i32_1 = arith.constant 0 : i32
    return %c0_i32, %c0_i32_0 : i32, i32
  }
  func.func @transform_2(%arg0: i32) -> (i32, i32, i32) {
    %c0_i32 = arith.constant 0 : i32
    %c0_i32_0 = arith.constant 0 : i32
    %c0_i32_1 = arith.constant 0 : i32
    return %arg0, %c0_i32, %c0_i32_0 : i32, i32, i32
  }
  func.func @transform_3(%arg0: i32) -> (i32, i32, i32) {
    %c0_i32 = arith.constant 0 : i32
    %c0_i32_0 = arith.constant 0 : i32
    %c0_i32_1 = arith.constant 0 : i32
    return %arg0, %c0_i32, %c0_i32_0 : i32, i32, i32
  }
  func.func @transform_4(%arg0: i32) -> (i32, i32, i32) {
    %c0_i32 = arith.constant 0 : i32
    %c0_i32_0 = arith.constant 0 : i32
    %c0_i32_1 = arith.constant 0 : i32
    return %arg0, %c0_i32, %c0_i32_0 : i32, i32, i32
  }
}

module attributes {stable_mosaic.version = 11 : i64} {
  func.func @bn1_pw_stats_kernel(%arg0: i32, %arg1: memref<1x16x64xf32, #tpu.memory_space<vmem>>, %arg2: memref<1x64xf32, #tpu.memory_space<vmem>>, %arg3: memref<1x64xf32, #tpu.memory_space<vmem>>, %arg4: memref<64x128xf32, #tpu.memory_space<vmem>>, %arg5: memref<1x16x128xf32, #tpu.memory_space<vmem>>, %arg6: memref<1x1x128xf32, #tpu.memory_space<vmem>>, %arg7: memref<1x1x128xf32, #tpu.memory_space<vmem>>) attributes {dimension_semantics = [#tpu.dimension_semantics<parallel>], iteration_bounds = array<i64: 2>, scalar_prefetch = 0 : i64, scratch_operands = 0 : i64, tpu.core_type = #tpu.core_type<tc>, window_params = [{transform_indices = @transform_0, window_bounds = array<i64: 1, 16, 64>}, {pipeline_mode = #tpu.pipeline_mode<synchronous>, transform_indices = @transform_1, window_bounds = array<i64: 1, 64>}, {pipeline_mode = #tpu.pipeline_mode<synchronous>, transform_indices = @transform_2, window_bounds = array<i64: 1, 64>}, {pipeline_mode = #tpu.pipeline_mode<synchronous>, transform_indices = @transform_3, window_bounds = array<i64: 64, 128>}, {transform_indices = @transform_4, window_bounds = array<i64: 1, 16, 128>}, {transform_indices = @transform_5, window_bounds = array<i64: 1, 1, 128>}, {transform_indices = @transform_6, window_bounds = array<i64: 1, 1, 128>}]} {
    %c0 = arith.constant 0 : index
    %c0_0 = arith.constant 0 : index
    %c0_1 = arith.constant 0 : index
    %0 = vector.load %arg1[%c0, %c0_0, %c0_1] : memref<1x16x64xf32, #tpu.memory_space<vmem>>, vector<1x16x64xf32>
    %1 = vector.shape_cast %0 : vector<1x16x64xf32> to vector<16x64xf32>
    %c0_2 = arith.constant 0 : index
    %c0_3 = arith.constant 0 : index
    %2 = vector.load %arg2[%c0_2, %c0_3] : memref<1x64xf32, #tpu.memory_space<vmem>>, vector<1x64xf32>
    %3 = vector.broadcast %2 : vector<1x64xf32> to vector<16x64xf32>
    %4 = arith.mulf %1, %3 : vector<16x64xf32>
    %c0_4 = arith.constant 0 : index
    %c0_5 = arith.constant 0 : index
    %5 = vector.load %arg3[%c0_4, %c0_5] : memref<1x64xf32, #tpu.memory_space<vmem>>, vector<1x64xf32>
    %6 = vector.broadcast %5 : vector<1x64xf32> to vector<16x64xf32>
    %7 = arith.addf %4, %6 : vector<16x64xf32>
    %cst = arith.constant 0.000000e+00 : f32
    %8 = vector.broadcast %cst : f32 to vector<16x64xf32>
    %9 = arith.maximumf %7, %8 : vector<16x64xf32>
    %c0_6 = arith.constant 0 : index
    %c0_7 = arith.constant 0 : index
    %10 = vector.load %arg4[%c0_6, %c0_7] : memref<64x128xf32, #tpu.memory_space<vmem>>, vector<64x128xf32>
    %cst_8 = arith.constant dense<0.000000e+00> : vector<16x128xf32>
    %11 = tpu.matmul %9, %10, %cst_8 {dimension_numbers = #tpu.dot_dimension_numbers<[1], [0], [0], [1], [0, 0, 1, 1], [], []>} : vector<16x64xf32>, vector<64x128xf32>, vector<16x128xf32> -> vector<16x128xf32>
    %c0_9 = arith.constant 0 : index
    %c0_10 = arith.constant 0 : index
    %c0_11 = arith.constant 0 : index
    %12 = vector.load %arg5[%c0_9, %c0_10, %c0_11] : memref<1x16x128xf32, #tpu.memory_space<vmem>>, vector<1x16x128xf32>
    %13 = vector.shape_cast %12 : vector<1x16x128xf32> to vector<16x128xf32>
    %14 = vector.shape_cast %11 : vector<16x128xf32> to vector<1x16x128xf32>
    tpu.vector_store %arg5[%c0_9, %c0_10, %c0_11], %14 {strides = array<i32>} : memref<1x16x128xf32, #tpu.memory_space<vmem>>, vector<1x16x128xf32>,
    %cst_12 = arith.constant dense<0.000000e+00> : vector<128xf32>
    %15 = vector.multi_reduction <add>, %11, %cst_12 [0] : vector<16x128xf32> to vector<128xf32>
    %16 = vector.shape_cast %15 : vector<128xf32> to vector<1x128xf32>
    %c0_13 = arith.constant 0 : index
    %c0_14 = arith.constant 0 : index
    %c0_15 = arith.constant 0 : index
    %17 = vector.load %arg6[%c0_13, %c0_14, %c0_15] : memref<1x1x128xf32, #tpu.memory_space<vmem>>, vector<1x1x128xf32>
    %18 = vector.shape_cast %17 : vector<1x1x128xf32> to vector<1x128xf32>
    %19 = vector.shape_cast %16 : vector<1x128xf32> to vector<1x1x128xf32>
    tpu.vector_store %arg6[%c0_13, %c0_14, %c0_15], %19 {strides = array<i32>} : memref<1x1x128xf32, #tpu.memory_space<vmem>>, vector<1x1x128xf32>,
    %20 = arith.mulf %11, %11 : vector<16x128xf32>
    %cst_16 = arith.constant dense<0.000000e+00> : vector<128xf32>
    %21 = vector.multi_reduction <add>, %20, %cst_16 [0] : vector<16x128xf32> to vector<128xf32>
    %22 = vector.shape_cast %21 : vector<128xf32> to vector<1x128xf32>
    %c0_17 = arith.constant 0 : index
    %c0_18 = arith.constant 0 : index
    %c0_19 = arith.constant 0 : index
    %23 = vector.load %arg7[%c0_17, %c0_18, %c0_19] : memref<1x1x128xf32, #tpu.memory_space<vmem>>, vector<1x1x128xf32>
    %24 = vector.shape_cast %23 : vector<1x1x128xf32> to vector<1x128xf32>
    %25 = vector.shape_cast %22 : vector<1x128xf32> to vector<1x1x128xf32>
    tpu.vector_store %arg7[%c0_17, %c0_18, %c0_19], %25 {strides = array<i32>} : memref<1x1x128xf32, #tpu.memory_space<vmem>>, vector<1x1x128xf32>,
    return
  }
  func.func @transform_0(%arg0: i32) -> (i32, i32, i32) {
    %c0_i32 = arith.constant 0 : i32
    %c0_i32_0 = arith.constant 0 : i32
    %c0_i32_1 = arith.constant 0 : i32
    return %arg0, %c0_i32, %c0_i32_0 : i32, i32, i32
  }
  func.func @transform_1(%arg0: i32) -> (i32, i32) {
    %c0_i32 = arith.constant 0 : i32
    %c0_i32_0 = arith.constant 0 : i32
    %c0_i32_1 = arith.constant 0 : i32
    return %c0_i32, %c0_i32_0 : i32, i32
  }
  func.func @transform_2(%arg0: i32) -> (i32, i32) {
    %c0_i32 = arith.constant 0 : i32
    %c0_i32_0 = arith.constant 0 : i32
    %c0_i32_1 = arith.constant 0 : i32
    return %c0_i32, %c0_i32_0 : i32, i32
  }
  func.func @transform_3(%arg0: i32) -> (i32, i32) {
    %c0_i32 = arith.constant 0 : i32
    %c0_i32_0 = arith.constant 0 : i32
    %c0_i32_1 = arith.constant 0 : i32
    return %c0_i32, %c0_i32_0 : i32, i32
  }
  func.func @transform_4(%arg0: i32) -> (i32, i32, i32) {
    %c0_i32 = arith.constant 0 : i32
    %c0_i32_0 = arith.constant 0 : i32
    %c0_i32_1 = arith.constant 0 : i32
    return %arg0, %c0_i32, %c0_i32_0 : i32, i32, i32
  }
  func.func @transform_5(%arg0: i32) -> (i32, i32, i32) {
    %c0_i32 = arith.constant 0 : i32
    %c0_i32_0 = arith.constant 0 : i32
    %c0_i32_1 = arith.constant 0 : i32
    return %arg0, %c0_i32, %c0_i32_0 : i32, i32, i32
  }
  func.func @transform_6(%arg0: i32) -> (i32, i32, i32) {
    %c0_i32 = arith.constant 0 : i32
    %c0_i32_0 = arith.constant 0 : i32
    %c0_i32_1 = arith.constant 0 : i32
    return %arg0, %c0_i32, %c0_i32_0 : i32, i32, i32
  }
}

</mosaic_0001>

<bundles_post_ra>
// kernel: basic_block.2
= control target key start
LH: loop header
LB: loop body
LE: loop exit
PB: predicated region body
PF: predicated region fallthrough
CT: control target
= control target key end

     0   :  { %s634_s15 = smov 0   ;;  %s719_s0 = inlined_call_operand.vmem [shape: f32[2,16,64], index: 0, kind: input, shape index: {}]   ;;  %s720_s1 = inlined_call_operand.vmem [shape: f32[9,64], index: 1, kind: input, shape index: {}]   ;;  %s721_s2 = inlined_call_operand.vmem [shape: f32[2,16,64], index: 2, kind: output, shape index: {0}]   ;;  %s722_s3 = inlined_call_operand.vmem [shape: f32[2,1,64], index: 3, kind: output, shape index: {1}]   ;;  %s723_s4 = inlined_call_operand.vmem [shape: f32[2,1,64], index: 4, kind: output, shape index: {2}]  }
   0x1 LB: > { %s569_s16 = sadd.s32 4294967295, %s602_s15   ;;  %p573_p0 = scmp.ge.s32.totalorder %s602_s15, 1  ;;  %s602_s15 = sphi %s634_s15, %s15_s15  }
   0x2   : > { %p167_p1 = scmp.lt.s32.totalorder %s602_s15, 3 }
   0x4   : > { %p168_p2 = pnand %p573_p0, %p167_p1 }
   0x5   : > { %p199_p3 = scmp.lt.s32.totalorder (!%p168_p2), %s569_s16, 1  ;;  %s605_s23 = smov (!%p168_p2), 4  }
   0x6   : > { %171 = sbr.rel (%p168_p2) target bundleno = 300 (0x12c), region = 28  ;;  %s606_s24 = smov (!%p168_p2), 8  }
   0x7   : > { %s607_s27 = smov (!%p168_p2), 124   ;;  %s608_s28 = smov (!%p168_p2), 120  }
   0xb   : > { %v242_v0 = vlaneseq  ;;  %vm215_vm0 = vcmask 581632   ;;  %vm218_vm1 = vcmask 31744   ;;  %vm221_vm2 = vcmask 589344   ;;  %s725_s16 = smov (!%p199_p3, %s569_s16), 1  ;;  %v237_v3 = vld [vmem:[%s720_s1] sm:$0xff] }
   0xc   : > { %v604_v2 = vmov 0.0   ;;  %s581_s19 = sshll.u32 %s725_s16, 4  ;;  %v578_v22 = vld [vmem:[%s720_s1 + $0x8] ss:$0 sm:$0xff]  ;;  %vm234_vm3 = vcmask 556064   ;;  %vm300_vm4 = vcmask 1046528   ;;  %s211_s8 = scalar_lea.vmem %s722_s3, %s725_s16 }
   0xd   : > { %v243_v1 = vshrl.u32 %v242_v0, 7  ;;  %216 = vst.msk [vmem:[#allocation2] sm:$0x1] %vm215_vm0, %v604_v2  ;;  %217 = vst.msk [vmem:[#allocation2 + $0x11] sm:$0x1] %vm215_vm0, %v604_v2  ;;  %s203_s22 = scalar_lea.vmem %s719_s0, %s581_s19  ;;  %vm374_vm5 = vcmask 1045504   ;;  %s208_s5 = scalar_lea.vmem %s721_s2, %s581_s19 }
   0xe   : > { %219 = vst.msk [vmem:[#allocation2 + $0x1] sm:$0xff] %vm218_vm1, %v604_v2  ;;  %220 = vst.msk [vmem:[#allocation2 + $0x9] sm:$0xff] %vm218_vm1, %v604_v2  ;;  %v224_v9 = vld [vmem:[%s203_s22] sm:$0xff]  ;;  %v225_v15 = vld [vmem:[%s203_s22 + $0x8] sm:$0xff]  ;;  %vm438_vm6 = vcmask 523264   ;;  %vm450_vm7 = vcmask 516096   ;;  %s214_s11 = scalar_lea.vmem %s723_s4, %s725_s16 }
   0xf   : > { %222 = vst.msk [vmem:[#allocation2 + $0x1] sm:$0xff] %vm221_vm2, %v604_v2  ;;  %223 = vst.msk [vmem:[#allocation2 + $0x9] sm:$0xff] %vm221_vm2, %v604_v2  ;;  %v252_v4 = vsub.s32 1, %v243_v1  ;;  %v272_v5 = vsub.s32 2, %v243_v1  ;;  %v244_v6 = vsub.s32 0, %v243_v1  ;;  %v292_v7 = vsub.s32 3, %v243_v1  ;;  %228 = vrot.lane.b32.xlu0 %v224_v9, %s605_s23 }
  0x10   : > { %v366_v8 = vsub.s32 6, %v243_v1  ;;  %v312_v11 = vsub.s32 4, %v243_v1  ;;  %v339_v17 = vsub.s32 5, %v243_v1  ;;  %v386_v19 = vsub.s32 7, %v243_v1 }
  0x11   : > { %v253_v10 = vrot.slane %v237_v3, %v252_v4  ;;  %v653_v12 = vrot.slane %v237_v3, %v244_v6  ;;  %v655_v13 = vrot.slane %v237_v3, %v292_v7  ;;  %v273_v16 = vrot.slane %v237_v3, %v272_v5 }
  0x12   : > { %v657_v14 = vrot.slane %v237_v3, %v366_v8  ;;  %v313_v18 = vrot.slane %v237_v3, %v312_v11  ;;  %v340_v20 = vrot.slane %v237_v3, %v339_v17  ;;  %v387_v21 = vrot.slane %v237_v3, %v386_v19 }
  0x13   : > { %255 = vrot.lane.b32.xlu1 %v253_v10, %s605_s23  ;;  %230 = vrot.lane.b32.xlu0 %v225_v15, %s605_s23 }
  0x17   : > { %275 = vrot.lane.b32.xlu1 %v273_v16, %s606_s24  ;;  %315 = vrot.lane.b32.xlu0 %v313_v18, %s605_s23 }
  0x1b   : > { %342 = vrot.lane.b32.xlu1 %v340_v20, %s606_s24  ;;  %389 = vrot.lane.b32.xlu0 %v387_v21, %s605_s23 }
  0x1f   : > { %416 = vrot.lane.b32.xlu1 %v578_v22, %s606_s24 }
  0x81   : > { %v229_v23 = vpop.permute.xlu0 %228 }
  0x82   : > { %235 = vst.msk [vmem:[#allocation2 + $0x1] sm:$0xff] %vm234_vm3, %v229_v23 }
  0x85   : > { %v256_v24 = vpop.permute.xlu1 %255  ;;  %v231_v25 = vpop.permute.xlu0 %230 }
  0x86   : > { %236 = vst.msk [vmem:[#allocation2 + $0x9] sm:$0xff] %vm234_vm3, %v231_v25 }
  0x89   : > { %v276_v26 = vpop.permute.xlu1 %275  ;;  %v239_v27 = vld [vmem:[#allocation2] sm:$0xff]  ;;  %v316_v28 = vpop.permute.xlu0 %315 }
  0x8a   : > { %v258_v29 = vmul.f32 %v256_v24, %v239_v27  ;;  %v663_v30 = vmul.f32 %v653_v12, %v239_v27  ;;  %v294_v32 = vmul.f32 %v655_v13, %v239_v27  ;;  %v368_v33 = vmul.f32 %v657_v14, %v239_v27 }
  0x8b   : > { %v318_v36 = vmul.f32 %v316_v28, %v239_v27  ;;  %v278_v37 = vmul.f32 %v276_v26, %v239_v27 }
  0x8c   : > { %262 = vrot.lane.b32.xlu0 %v258_v29, %s607_s27  ;;  %v301_v52 = vrot.slane %v294_v32, 1  ;;  %v375_v53 = vrot.slane %v368_v33, 2 }
  0x8d   : > { %v343_v31 = vpop.permute.xlu1 %342  ;;  %v240_v34 = vld [vmem:[#allocation2 + $0x8] sm:$0xff]  ;;  %v241_v35 = vld [vmem:[#allocation2 + $0x10] sm:$0x3]  ;;  %v390_v41 = vpop.permute.xlu0 %389  ;;  %v324_v44 = vrot.slane %v318_v36, 1 }
  0x8e   : > { %v319_v38 = vmul.f32 %v316_v28, %v240_v34  ;;  %v345_v39 = vmul.f32 %v343_v31, %v239_v27  ;;  %v346_v40 = vmul.f32 %v343_v31, %v240_v34  ;;  %v320_v42 = vmul.f32 %v316_v28, %v241_v35 }
  0x8f   : > { %v392_v47 = vmul.f32 %v390_v41, %v239_v27  ;;  %v393_v48 = vmul.f32 %v390_v41, %v240_v34  ;;  %v259_v49 = vmul.f32 %v256_v24, %v240_v34  ;;  %v279_v54 = vmul.f32 %v276_v26, %v240_v34 }
  0x90   : > { %v325_v43 = vrot.slane %v319_v38, 1  ;;  %282 = vrot.lane.b32.xlu0 %v278_v37, %s608_s28  ;;  %v351_v46 = vrot.slane %v345_v39, 1  ;;  %v352_v50 = vrot.slane %v346_v40, 1  ;;  %v327_v55 = vrot.slane %v320_v42, 1 }
  0x91   : > { %v417_v45 = vpop.permute.xlu1 %416  ;;  %v347_v56 = vmul.f32 %v343_v31, %v241_v35  ;;  %264 = vrot.lane.b32.xlu1 %v259_v49, %s607_s27  ;;  %v247_v58 = vmul.f32 %v653_v12, %v240_v34  ;;  %v295_v59 = vmul.f32 %v655_v13, %v240_v34  ;;  %v296_v60 = vmul.f32 %v655_v13, %v241_v35 }
  0x92   : > { %v326_v51 = vsel %vm300_vm4, %v324_v44, %v325_v43  ;;  %v419_v57 = vmul.f32 %v417_v45, %v239_v27  ;;  %v369_v61 = vmul.f32 %v657_v14, %v240_v34  ;;  %v398_v62 = vrot.slane %v392_v47, 2 }
  0x93   : > { %v399_v63 = vrot.slane %v393_v48, 2  ;;  %v420_v0 = vmul.f32 %v417_v45, %v240_v34  ;;  %v370_v1 = vmul.f32 %v657_v14, %v241_v35  ;;  %v353_v2 = vsel %vm300_vm4, %v351_v46, %v352_v50 }
  0x94   : > { %329 = vrot.lane.b32.xlu0 %v326_v51, %s607_s27  ;;  %v302_v3 = vrot.slane %v295_v59, 1  ;;  %v304_v4 = vrot.slane %v296_v60, 1  ;;  %v376_v5 = vrot.slane %v369_v61, 2  ;;  %v354_v10 = vrot.slane %v347_v56, 1 }
  0x95   : > { %284 = vrot.lane.b32.xlu1 %v279_v54, %s608_s28  ;;  %v378_v6 = vrot.slane %v370_v1, 2  ;;  %v394_v11 = vmul.f32 %v390_v41, %v241_v35  ;;  %v425_v13 = vrot.slane %v419_v57, 2  ;;  %v426_v14 = vrot.slane %v420_v0, 2 }
  0x96   : > { %v303_v7 = vsel %vm300_vm4, %v301_v52, %v302_v3  ;;  %v305_v8 = vsel %vm300_vm4, %v302_v3, %v304_v4  ;;  %v377_v9 = vsel %vm374_vm5, %v375_v53, %v376_v5  ;;  %v328_v15 = vsel %vm300_vm4, %v325_v43, %v327_v55 }
  0x97   : > { %v379_v12 = vsel %vm374_vm5, %v376_v5, %v378_v6  ;;  %v400_v16 = vsel %vm374_vm5, %v398_v62, %v399_v63  ;;  %v401_v17 = vrot.slane %v394_v11, 2  ;;  %v421_v18 = vmul.f32 %v417_v45, %v241_v35 }
  0x98   : > { %356 = vrot.lane.b32.xlu0 %v353_v2, %s608_s28  ;;  %v355_v19 = vsel %vm300_vm4, %v352_v50, %v354_v10  ;;  %v427_v20 = vsel %vm374_vm5, %v425_v13, %v426_v14 }
  0x99   : > { %331 = vrot.lane.b32.xlu1 %v328_v15, %s607_s27  ;;  %v428_v21 = vrot.slane %v421_v18, 2  ;;  %v402_v22 = vsel %vm374_vm5, %v399_v63, %v401_v17 }
  0x9b   : > { %v429_v23 = vsel %vm374_vm5, %v426_v14, %v428_v21 }
  0x9c   : > { %403 = vrot.lane.b32.xlu0 %v400_v16, %s607_s27 }
  0x9d   : > { %358 = vrot.lane.b32.xlu1 %v355_v19, %s608_s28 }
  0xa0   : > { %430 = vrot.lane.b32.xlu0 %v427_v20, %s608_s28 }
  0xa1   : > { %405 = vrot.lane.b32.xlu1 %v402_v22, %s607_s27 }
  0xa5   : > { %432 = vrot.lane.b32.xlu1 %v429_v23, %s608_s28 }
  0xfe   : > { %v263_v24 = vpop.permute.xlu0 %262 }
  0xff   : > { %v268_v25 = vadd.f32 %v263_v24, %v663_v30 }
 0x102   : > { %v283_v26 = vpop.permute.xlu0 %282 }
 0x103   : > { %v288_v27 = vadd.f32 %v283_v26, %v268_v25  ;;  %v265_v29 = vpop.permute.xlu1 %264 }
 0x104   : > { %v269_v32 = vadd.f32 %v265_v29, %v247_v58 }
 0x105   : > { %v308_v28 = vadd.f32 %v303_v7, %v288_v27 }
 0x106   : > { %v330_v31 = vpop.permute.xlu0 %329 }
 0x107   : > { %v335_v33 = vadd.f32 %v330_v31, %v308_v28  ;;  %v285_v34 = vpop.permute.xlu1 %284 }
 0x108   : > { %v289_v36 = vadd.f32 %v285_v34, %v269_v32 }
 0x10a   : > { %v357_v35 = vpop.permute.xlu0 %356  ;;  %v309_v38 = vadd.f32 %v305_v8, %v289_v36 }
 0x10b   : > { %v362_v37 = vadd.f32 %v357_v35, %v335_v33  ;;  %v332_v40 = vpop.permute.xlu1 %331 }
 0x10c   : > { %v336_v42 = vadd.f32 %v332_v40, %v309_v38 }
 0x10d   : > { %v382_v39 = vadd.f32 %v377_v9, %v362_v37 }
 0x10e   : > { %v404_v41 = vpop.permute.xlu0 %403 }
 0x10f   : > { %v409_v43 = vadd.f32 %v404_v41, %v382_v39  ;;  %v359_v30 = vpop.permute.xlu1 %358 }
 0x110   : > { %v363_v45 = vadd.f32 %v359_v30, %v336_v42 }
 0x112   : > { %v431_v44 = vpop.permute.xlu0 %430  ;;  %v383_v47 = vadd.f32 %v379_v12, %v363_v45 }
 0x113   : > { %v436_v46 = vadd.f32 %v431_v44, %v409_v43  ;;  %v406_v48 = vpop.permute.xlu1 %405 }
 0x114   : > { %v410_v49 = vadd.f32 %v406_v48, %v383_v47 }
 0x115   : > { %439 = vst.msk [vmem:[%s208_s5] sm:$0xff] %vm438_vm6, %v436_v46  ;;  %v452_v51 = vmul.f32 %v436_v46, %v436_v46  ;;  %v441_v53 = vsel %vm438_vm6, %v436_v46, 0.0 }
 0x117   : > { %v433_v50 = vpop.permute.xlu1 %432  ;;  %v454_v57 = vsel %vm438_vm6, %v452_v51, 0.0 }
 0x118   : > { %v437_v52 = vadd.f32 %v433_v50, %v410_v49 }
 0x11a   : > { %440 = vst.msk [vmem:[%s208_s5 + $0x8] sm:$0xff] %vm438_vm6, %v437_v52  ;;  %v442_v54 = vsel %vm438_vm6, %v437_v52, 0.0  ;;  %v453_v55 = vmul.f32 %v437_v52, %v437_v52 }
 0x11b   : > { %v443_v56 = vadd.f32 %v442_v54, %v441_v53 }
 0x11c   : > { %v455_v58 = vsel %vm438_vm6, %v453_v55, 0.0 }
 0x11d   : > { %v444_v59 = vrot.slane %v443_v56, 4  ;;  %v456_v60 = vadd.f32 %v455_v58, %v454_v57 }
 0x11f   : > { %v445_v61 = vadd.f32 %v444_v59, %v443_v56  ;;  %v457_v62 = vrot.slane %v456_v60, 4 }
 0x121   : > { %v446_v63 = vrot.slane %v445_v61, 2  ;;  %v458_v0 = vadd.f32 %v457_v62, %v456_v60 }
 0x123   : > { %v447_v1 = vadd.f32 %v446_v63, %v445_v61  ;;  %v459_v2 = vrot.slane %v458_v0, 2 }
 0x125   : > { %v448_v3 = vrot.slane %v447_v1, 1  ;;  %v460_v4 = vadd.f32 %v459_v2, %v458_v0 }
 0x127   : > { %v449_v5 = vadd.f32 %v448_v3, %v447_v1  ;;  %v461_v6 = vrot.slane %v460_v4, 1 }
 0x129   : > { %451 = vst.msk [vmem:[%s211_s8] sm:$0x1] %vm450_vm7, %v449_v5  ;;  %v462_v7 = vadd.f32 %v461_v6, %v460_v4 }
 0x12b   : > { %463 = vst.msk [vmem:[%s214_s11] sm:$0x1] %vm450_vm7, %v462_v7 }
 0x12c PF: > { %s15_s15 = sadd.s32 1, %s602_s15  }
 0x12d   : > { %p12_p4 = scmp.ge.s32.totalorder %s15_s15, 4  }
 0x12f   :  { %14 = sbr.rel (!%p12_p4) target bundleno = 1 (0x1), region = 82 }

// kernel: basic_block.3
= control target key start
LH: loop header
LB: loop body
LE: loop exit
PB: predicated region body
PF: predicated region fallthrough
CT: control target
= control target key end

     0   :  { %s603_s21 = smov 0   ;;  %s665_s0 = inlined_call_operand.vmem [shape: f32[2,16,64], index: 0, kind: input, shape index: {}]   ;;  %s666_s1 = inlined_call_operand.vmem [shape: f32[1,64], index: 1, kind: input, shape index: {}]   ;;  %s667_s2 = inlined_call_operand.vmem [shape: f32[1,64], index: 2, kind: input, shape index: {}]   ;;  %s668_s3 = inlined_call_operand.vmem [shape: f32[64,128], index: 3, kind: input, shape index: {}]   ;;  %s669_s4 = inlined_call_operand.vmem [shape: f32[2,16,128], index: 4, kind: output, shape index: {0}]   ;;  %s670_s5 = inlined_call_operand.vmem [shape: f32[2,1,128], index: 5, kind: output, shape index: {1}]   ;;  %s671_s6 = inlined_call_operand.vmem [shape: f32[2,1,128], index: 6, kind: output, shape index: {2}]  }
   0x1 LB: > { %s506_s22 = sadd.s32 4294967295, %s566_s21   ;;  %p510_p0 = scmp.ge.s32.totalorder %s566_s21, 1  ;;  %s566_s21 = sphi %s603_s21, %s17_s21  }
   0x2   : > { %p217_p1 = scmp.lt.s32.totalorder %s566_s21, 3 }
   0x4   : > { %p218_p2 = pnand %p510_p0, %p217_p1 }
   0x5   : > { %p253_p3 = scmp.lt.s32.totalorder (!%p218_p2), %s506_s22, 1 }
   0x6   : > { %221 = sbr.rel (%p218_p2) target bundleno = 240 (0xf0), region = 36 }
   0xb   : > { %v298_v0 = vld [vmem:[%s668_s3 + $0x38] sm:$0xff]  ;;  %v297_v1 = vld [vmem:[%s668_s3 + $0x30] sm:$0xff]  ;;  %v296_v2 = vld [vmem:[%s668_s3 + $0x28] sm:$0xff]  ;;  %s673_s22 = smov (!%p253_p3, %s506_s22), 1  ;;  %vm299_vm0 = vcmask 523264  }
   0xc   : > { %533 = vmatprep.subr.mxu0 %v298_v0  ;;  %v295_v3 = vld [vmem:[%s668_s3 + $0x20] sm:$0xff]  ;;  %s521_s7 = sshll.u32 %s673_s22, 4  ;;  %v294_v5 = vld [vmem:[%s668_s3 + $0x18] sm:$0xff]  ;;  %v293_v11 = vld [vmem:[%s668_s3 + $0x10] sm:$0xff]  ;;  %s265_s30 = scalar_lea.vmem %s670_s5, %s673_s22 }
   0xd   : > { %534 = vmatpush3.msra.mxu0 %v298_v0  ;;  %v515_v4 = vld [vmem:[%s666_s1] ss:$0 sm:$0xff]  ;;  %s257_s14 = scalar_lea.vmem %s665_s0, %s521_s7  ;;  %v292_v14 = vld [vmem:[%s668_s3 + $0x8] sm:$0xff]  ;;  %s262_s27 = scalar_lea.vmem %s669_s4, %s521_s7 }
   0xe   : > { %535 = vmatprep.subr.mxu0 %v297_v1  ;;  %v269_v6 = vld [vmem:[%s257_s14] sm:$0xff]  ;;  %v270_v7 = vld [vmem:[%s257_s14 + $0x8] sm:$0xff]  ;;  %s268_s9 = scalar_lea.vmem %s671_s6, %s673_s22 }
   0xf   : > { %536 = vmatpush3.msra.mxu0 %v297_v1  ;;  %v516_v8 = vld [vmem:[%s667_s2] ss:$0 sm:$0xff]  ;;  %v278_v9 = vmul.f32 %v515_v4, %v269_v6  ;;  %v279_v10 = vmul.f32 %v515_v4, %v270_v7 }
  0x10   : > { %537 = vmatprep.subr.mxu0 %v296_v2  ;;  %v291_v16 = vld [vmem:[%s668_s3] sm:$0xff] }
  0x11   : > { %538 = vmatpush3.msra.mxu0 %v296_v2  ;;  %v287_v12 = vadd.f32 %v516_v8, %v278_v9  ;;  %v288_v13 = vadd.f32 %v516_v8, %v279_v10 }
  0x12   : > { %539 = vmatprep.subr.mxu0 %v295_v3 }
  0x13   : > { %540 = vmatpush3.msra.mxu0 %v295_v3  ;;  %v289_v15 = vmax.f32 %v287_v12, 0.0  ;;  %v290_v17 = vmax.f32 %v288_v13, 0.0 }
  0x14   : > { %541 = vmatprep.subr.mxu0 %v294_v5 }
  0x15   : > { %542 = vmatpush3.msra.mxu0 %v294_v5  ;;  %549 = vmatprep.mubr.msk.f32.mxu0 %vm299_vm0, %v289_v15 }
  0x16   : > { %543 = vmatprep.subr.mxu0 %v293_v11 }
  0x17   : > { %544 = vmatpush3.msra.mxu0 %v293_v11 }
  0x18   : > { %545 = vmatprep.subr.mxu0 %v292_v14 }
  0x19   : > { %546 = vmatpush3.msra.mxu0 %v292_v14 }
  0x1a   : > { %547 = vmatprep.subr.mxu0 %v291_v16 }
  0x1b   : > { %548 = vmatpush3.msra.mxu0 %v291_v16 }
  0x1c   : > { %550 = vmatmul.mubr.msk.f32.vlgmr.msra.gmra.mxu0 %vm299_vm0, %v290_v17 }
  0xdc   : > { %v551_v18 = vpop.f32.mrf.mxu0 }
  0xdd   : > { %382 = vst [vmem:[%s262_s27 + $0x8] sm:$0xff] %v551_v18  ;;  %v392_v20 = vmul.f32 %v551_v18, %v551_v18 }
  0xde   : > { %v372_v19 = vpop.f32.mrf.mxu0 }
  0xdf   : > { %381 = vst [vmem:[%s262_s27] sm:$0xff] %v372_v19  ;;  %v383_v21 = vadd.f32 %v551_v18, %v372_v19  ;;  %v391_v22 = vmul.f32 %v372_v19, %v372_v19 }
  0xe1   : > { %v384_v23 = vrot.slane %v383_v21, 4  ;;  %v393_v24 = vadd.f32 %v392_v20, %v391_v22 }
  0xe3   : > { %v385_v25 = vadd.f32 %v384_v23, %v383_v21  ;;  %v394_v26 = vrot.slane %v393_v24, 4 }
  0xe5   : > { %v386_v27 = vrot.slane %v385_v25, 2  ;;  %v395_v28 = vadd.f32 %v394_v26, %v393_v24 }
  0xe7   : > { %v387_v29 = vadd.f32 %v386_v27, %v385_v25  ;;  %v396_v30 = vrot.slane %v395_v28, 2 }
  0xe9   : > { %v388_v31 = vrot.slane %v387_v29, 1  ;;  %v397_v32 = vadd.f32 %v396_v30, %v395_v28 }
  0xeb   : > { %v389_v33 = vadd.f32 %v388_v31, %v387_v29  ;;  %v398_v34 = vrot.slane %v397_v32, 1 }
  0xed   : > { %390 = vst [vmem:[%s265_s30] sm:$0x1] %v389_v33  ;;  %v399_v35 = vadd.f32 %v398_v34, %v397_v32 }
  0xef   : > { %400 = vst [vmem:[%s268_s9] sm:$0x1] %v399_v35 }
  0xf0 PF: > { %s17_s21 = sadd.s32 1, %s566_s21  }
  0xf1   : > { %p14_p4 = scmp.ge.s32.totalorder %s17_s21, 4  }
  0xf3   :  { %16 = sbr.rel (!%p14_p4) target bundleno = 1 (0x1), region = 90 }

</bundles_post_ra>
